<compile_context>
chip_gen: v7x
topology: tpu7x:2x2x1
jax: 0.10.0
libtpu: 0.0.40
codegen_flags: <defaults>
</compile_context>

<pallas_src>
import functools

import jax
import jax.numpy as jnp
from jax.experimental import pallas as pl
from jax.experimental.pallas import tpu as pltpu


# Max batch-tile rows. 1024 rows already sit at ~85% of HBM roofline for
# mem-bound kernels while keeping per-step VMEM well under a few MiB, so the
# grid has multiple steps (pipelining + v7x 2-TC sharding) for realistic B.
_TB_MAX = 1024


def _mlp_kernel(x_ref, w1_ref, b1_ref, w2_ref, b2_ref, w3_ref, b3_ref, o_ref):
    # One batch tile per grid step; all three matmuls + ReLUs fused.
    x = x_ref[...]  # (TB, 26) f32

    h1 = jnp.dot(x, w1_ref[...], preferred_element_type=jnp.float32)
    h1 = jnp.maximum(h1 + b1_ref[...], 0.0)

    h2 = jnp.dot(h1, w2_ref[...], preferred_element_type=jnp.float32)
    h2 = jnp.maximum(h2 + b2_ref[...], 0.0)

    y = jnp.dot(h2, w3_ref[...], preferred_element_type=jnp.float32)
    y = y + b3_ref[...]

    o_ref[...] = y.astype(o_ref.dtype)  # (TB, 100) — real width, no padding


def _round_up(n, m):
    return ((n + m - 1) // m) * m


@functools.partial(jax.jit, static_argnames=("tb_max",))
def net_forward(x, params, *, tb_max=_TB_MAX):
    """x: [B, in_feas] float32. params: dict with w1,b1,w2,b2,w3,b3 ([in,out] / [1,out])."""
    w1, b1 = params["w1"], params["b1"]
    w2, b2 = params["w2"], params["b2"]
    w3, b3 = params["w3"], params["b3"]

    B, in_feas = x.shape
    h1_f, h2_f = w1.shape[1], w2.shape[1]
    out_feas = w3.shape[1]

    # Balanced batch tile: split B into the fewest <=tb_max chunks, round the
    # tile to a multiple of 8 (sublane). Last grid block may be partial —
    # Pallas masks the out-of-range rows on store, so no wrapper padding.
    n_steps = max(1, pl.cdiv(B, tb_max))
    tb = max(8, _round_up(pl.cdiv(B, n_steps), 8))
    grid_b = pl.cdiv(B, tb)
    grid = (grid_b,)

    # Advisory cost estimate based on what the kernel actually moves/computes
    # (grid_b * tb rows, real 100-wide output).
    rows = grid_b * tb
    flops = 2 * rows * (in_feas * h1_f + h1_f * h2_f + h2_f * out_feas)
    bytes_accessed = (
        rows * in_feas * 4
        + rows * out_feas * 4
        + (in_feas * h1_f + h1_f + h1_f * h2_f + h2_f + h2_f * out_feas + out_feas) * 4
    )

    return pl.pallas_call(
        _mlp_kernel,
        out_shape=jax.ShapeDtypeStruct((B, out_feas), jnp.float32),
        grid_spec=pltpu.PrefetchScalarGridSpec(
            num_scalar_prefetch=0,
            grid=grid,
            in_specs=[
                # Streamed batch tile of activations (last dim = full array dim).
                pl.BlockSpec((tb, in_feas), lambda i: (i, 0)),
                # Weights / biases: full-array blocks, constant index_map ->
                # DMA'd once, resident in VMEM for the whole grid.
                pl.BlockSpec(w1.shape, lambda i: (0, 0)),
                pl.BlockSpec(b1.shape, lambda i: (0, 0)),
                pl.BlockSpec(w2.shape, lambda i: (0, 0)),
                pl.BlockSpec(b2.shape, lambda i: (0, 0)),
                pl.BlockSpec(w3.shape, lambda i: (0, 0)),
                pl.BlockSpec(b3.shape, lambda i: (0, 0)),
            ],
            # Real 100-wide output block (full last dim): no dead lanes in HBM
            # and no post-kernel slice pass.
            out_specs=pl.BlockSpec((tb, out_feas), lambda i: (i, 0)),
        ),
        compiler_params=pltpu.CompilerParams(
            dimension_semantics=("parallel",),  # v7x: shard batch over 2 TCs
            vmem_limit_bytes=32 * 1024 * 1024,  # safe on v5e/v6e/v7x
        ),
        cost_estimate=pl.CostEstimate(
            flops=flops, transcendentals=0, bytes_accessed=bytes_accessed
        ),
    )(x, w1, b1, w2, b2, w3, b3)


def init_params(key, in_feas=26, out_feas=100):
    """Deterministic init mimicking nn.Linear's uniform(-1/sqrt(fan_in), +)."""

    def linear(key, fan_in, fan_out):
        kw, kb = jax.random.split(key)
        bound = 1.0 / jnp.sqrt(jnp.float32(fan_in))
        w = jax.random.uniform(kw, (fan_in, fan_out), jnp.float32, -bound, bound)
        b = jax.random.uniform(kb, (1, fan_out), jnp.float32, -bound, bound)
        return w, b

    k1, k2, k3 = jax.random.split(key, 3)
    w1, b1 = linear(k1, in_feas, 64)
    w2, b2 = linear(k2, 64, 32)
    w3, b3 = linear(k3, 32, out_feas)
    return {"w1": w1, "b1": b1, "w2": w2, "b2": b2, "w3": w3, "b3": b3}


def net_forward_ref(x, p):
    """Pure-JAX reference for correctness check."""
    h1 = jnp.maximum(x @ p["w1"] + p["b1"], 0.0)
    h2 = jnp.maximum(h1 @ p["w2"] + p["b2"], 0.0)
    return h2 @ p["w3"] + p["b3"]


if __name__ == "__main__":
    key = jax.random.PRNGKey(0)
    kx1, kx2, kx3, kp = jax.random.split(key, 4)

    in_feas, out_feas = 26, 100
    params = init_params(kp, in_feas=in_feas, out_feas=out_feas)

    # Exact-tile batch, a ragged batch (partial last block), and a batch that
    # spans multiple grid steps.
    for kx, B in ((kx1, 8), (kx2, 37), (kx3, 2048 + 24)):
        x = jax.random.normal(kx, (B, in_feas), jnp.float32)
        y = jax.block_until_ready(net_forward(x, params))
        y_ref = net_forward_ref(x, params)
        assert y.shape == (B, out_feas), y.shape
        assert jnp.allclose(y, y_ref, atol=1e-5, rtol=1e-5), "mismatch vs reference"

    print("KERNEL_OK")
</pallas_src>

<mosaic_0001>
module attributes {stable_mosaic.version = 11 : i64} {
  func.func @_mlp_kernel(%arg0: i32, %arg1: memref<8x26xf32, #tpu.memory_space<vmem>>, %arg2: memref<26x64xf32, #tpu.memory_space<vmem>>, %arg3: memref<1x64xf32, #tpu.memory_space<vmem>>, %arg4: memref<64x32xf32, #tpu.memory_space<vmem>>, %arg5: memref<1x32xf32, #tpu.memory_space<vmem>>, %arg6: memref<32x100xf32, #tpu.memory_space<vmem>>, %arg7: memref<1x100xf32, #tpu.memory_space<vmem>>, %arg8: memref<8x100xf32, #tpu.memory_space<vmem>>) attributes {dimension_semantics = [#tpu.dimension_semantics<parallel>], iteration_bounds = array<i64: 1>, scalar_prefetch = 0 : i64, scratch_operands = 0 : i64, tpu.core_type = #tpu.core_type<tc>, window_params = [{transform_indices = @transform_0, window_bounds = array<i64: 8, 26>}, {pipeline_mode = #tpu.pipeline_mode<synchronous>, transform_indices = @transform_1, window_bounds = array<i64: 26, 64>}, {pipeline_mode = #tpu.pipeline_mode<synchronous>, transform_indices = @transform_2, window_bounds = array<i64: 1, 64>}, {pipeline_mode = #tpu.pipeline_mode<synchronous>, transform_indices = @transform_3, window_bounds = array<i64: 64, 32>}, {pipeline_mode = #tpu.pipeline_mode<synchronous>, transform_indices = @transform_4, window_bounds = array<i64: 1, 32>}, {pipeline_mode = #tpu.pipeline_mode<synchronous>, transform_indices = @transform_5, window_bounds = array<i64: 32, 100>}, {pipeline_mode = #tpu.pipeline_mode<synchronous>, transform_indices = @transform_6, window_bounds = array<i64: 1, 100>}, {transform_indices = @transform_7, window_bounds = array<i64: 8, 100>}]} {
    %c0 = arith.constant 0 : index
    %c0_0 = arith.constant 0 : index
    %0 = vector.load %arg1[%c0, %c0_0] : memref<8x26xf32, #tpu.memory_space<vmem>>, vector<8x26xf32>
    %c0_1 = arith.constant 0 : index
    %c0_2 = arith.constant 0 : index
    %1 = vector.load %arg2[%c0_1, %c0_2] : memref<26x64xf32, #tpu.memory_space<vmem>>, vector<26x64xf32>
    %cst = arith.constant dense<0.000000e+00> : vector<8x64xf32>
    %2 = tpu.matmul %0, %1, %cst {dimension_numbers = #tpu.dot_dimension_numbers<[1], [0], [0], [1], [0, 0, 1, 1], [], []>} : vector<8x26xf32>, vector<26x64xf32>, vector<8x64xf32> -> vector<8x64xf32>
    %c0_3 = arith.constant 0 : index
    %c0_4 = arith.constant 0 : index
    %3 = vector.load %arg3[%c0_3, %c0_4] : memref<1x64xf32, #tpu.memory_space<vmem>>, vector<1x64xf32>
    %4 = vector.broadcast %3 : vector<1x64xf32> to vector<8x64xf32>
    %5 = arith.addf %2, %4 : vector<8x64xf32>
    %cst_5 = arith.constant 0.000000e+00 : f32
    %6 = vector.broadcast %cst_5 : f32 to vector<8x64xf32>
    %7 = arith.maximumf %5, %6 : vector<8x64xf32>
    %c0_6 = arith.constant 0 : index
    %c0_7 = arith.constant 0 : index
    %8 = vector.load %arg4[%c0_6, %c0_7] : memref<64x32xf32, #tpu.memory_space<vmem>>, vector<64x32xf32>
    %cst_8 = arith.constant dense<0.000000e+00> : vector<8x32xf32>
    %9 = tpu.matmul %7, %8, %cst_8 {dimension_numbers = #tpu.dot_dimension_numbers<[1], [0], [0], [1], [0, 0, 1, 1], [], []>} : vector<8x64xf32>, vector<64x32xf32>, vector<8x32xf32> -> vector<8x32xf32>
    %c0_9 = arith.constant 0 : index
    %c0_10 = arith.constant 0 : index
    %10 = vector.load %arg5[%c0_9, %c0_10] : memref<1x32xf32, #tpu.memory_space<vmem>>, vector<1x32xf32>
    %11 = vector.broadcast %10 : vector<1x32xf32> to vector<8x32xf32>
    %12 = arith.addf %9, %11 : vector<8x32xf32>
    %cst_11 = arith.constant 0.000000e+00 : f32
    %13 = vector.broadcast %cst_11 : f32 to vector<8x32xf32>
    %14 = arith.maximumf %12, %13 : vector<8x32xf32>
    %c0_12 = arith.constant 0 : index
    %c0_13 = arith.constant 0 : index
    %15 = vector.load %arg6[%c0_12, %c0_13] : memref<32x100xf32, #tpu.memory_space<vmem>>, vector<32x100xf32>
    %cst_14 = arith.constant dense<0.000000e+00> : vector<8x100xf32>
    %16 = tpu.matmul %14, %15, %cst_14 {dimension_numbers = #tpu.dot_dimension_numbers<[1], [0], [0], [1], [0, 0, 1, 1], [], []>} : vector<8x32xf32>, vector<32x100xf32>, vector<8x100xf32> -> vector<8x100xf32>
    %c0_15 = arith.constant 0 : index
    %c0_16 = arith.constant 0 : index
    %17 = vector.load %arg7[%c0_15, %c0_16] : memref<1x100xf32, #tpu.memory_space<vmem>>, vector<1x100xf32>
    %18 = vector.broadcast %17 : vector<1x100xf32> to vector<8x100xf32>
    %19 = arith.addf %16, %18 : vector<8x100xf32>
    %c0_17 = arith.constant 0 : index
    %c0_18 = arith.constant 0 : index
    %20 = vector.load %arg8[%c0_17, %c0_18] : memref<8x100xf32, #tpu.memory_space<vmem>>, vector<8x100xf32>
    tpu.vector_store %arg8[%c0_17, %c0_18], %19 {strides = array<i32>} : memref<8x100xf32, #tpu.memory_space<vmem>>, vector<8x100xf32>,
    return
  }
  func.func @transform_0(%arg0: i32) -> (i32, i32) {
    %c0_i32 = arith.constant 0 : i32
    %c0_i32_0 = arith.constant 0 : i32
    return %arg0, %c0_i32 : i32, i32
  }
  func.func @transform_1(%arg0: i32) -> (i32, i32) {
    %c0_i32 = arith.constant 0 : i32
    %c0_i32_0 = arith.constant 0 : i32
    %c0_i32_1 = arith.constant 0 : i32
    return %c0_i32, %c0_i32_0 : i32, i32
  }
  func.func @transform_2(%arg0: i32) -> (i32, i32) {
    %c0_i32 = arith.constant 0 : i32
    %c0_i32_0 = arith.constant 0 : i32
    %c0_i32_1 = arith.constant 0 : i32
    return %c0_i32, %c0_i32_0 : i32, i32
  }
  func.func @transform_3(%arg0: i32) -> (i32, i32) {
    %c0_i32 = arith.constant 0 : i32
    %c0_i32_0 = arith.constant 0 : i32
    %c0_i32_1 = arith.constant 0 : i32
    return %c0_i32, %c0_i32_0 : i32, i32
  }
  func.func @transform_4(%arg0: i32) -> (i32, i32) {
    %c0_i32 = arith.constant 0 : i32
    %c0_i32_0 = arith.constant 0 : i32
    %c0_i32_1 = arith.constant 0 : i32
    return %c0_i32, %c0_i32_0 : i32, i32
  }
  func.func @transform_5(%arg0: i32) -> (i32, i32) {
    %c0_i32 = arith.constant 0 : i32
    %c0_i32_0 = arith.constant 0 : i32
    %c0_i32_1 = arith.constant 0 : i32
    return %c0_i32, %c0_i32_0 : i32, i32
  }
  func.func @transform_6(%arg0: i32) -> (i32, i32) {
    %c0_i32 = arith.constant 0 : i32
    %c0_i32_0 = arith.constant 0 : i32
    %c0_i32_1 = arith.constant 0 : i32
    return %c0_i32, %c0_i32_0 : i32, i32
  }
  func.func @transform_7(%arg0: i32) -> (i32, i32) {
    %c0_i32 = arith.constant 0 : i32
    %c0_i32_0 = arith.constant 0 : i32
    return %arg0, %c0_i32 : i32, i32
  }
}

</mosaic_0001>

<bundles_post_ra>
// kernel: net_forward.1
= control target key start
LH: loop header
LB: loop body
LE: loop exit
PB: predicated region body
PF: predicated region fallthrough
CT: control target
= control target key end

     0   :  { %vm43_vm0 = vcmask 1041408   ;;  %v430_v3 = vmov 0.0|0.0   ;;  %vm431_vm1 = vmmov 0   ;;  %v432_v6 = vmov 0.0   ;;  %s551_s0 = inlined_call_operand.vmem [shape: f32[8,26], index: 0, kind: input, shape index: {}]   ;;  %s552_s1 = inlined_call_operand.vmem [shape: f32[26,64], index: 1, kind: input, shape index: {}]   ;;  %s553_s2 = inlined_call_operand.vmem [shape: f32[1,64], index: 2, kind: input, shape index: {}]   ;;  %s554_s3 = inlined_call_operand.vmem [shape: f32[64,32], index: 3, kind: input, shape index: {}]   ;;  %s555_s4 = inlined_call_operand.vmem [shape: f32[1,32], index: 4, kind: input, shape index: {}]   ;;  %s556_s5 = inlined_call_operand.vmem [shape: f32[32,100], index: 5, kind: input, shape index: {}]   ;;  %s557_s6 = inlined_call_operand.vmem [shape: f32[1,100], index: 6, kind: input, shape index: {}]   ;;  %s558_s7 = inlined_call_operand.hbm [shape: f32[8,100], index: 7, kind: output, shape index: {}]  }
   0x1   :  { %v28_v0 = vld [vmem:[%s552_s1] sm:$0xff]  ;;  %v29_v1 = vld [vmem:[%s552_s1 + $0x8] sm:$0xff]  ;;  %v30_v2 = vld [vmem:[%s552_s1 + $0x10] sm:$0xff]  ;;  %376 = vmatprep.subr.bf16.mxu0 %v430_v3  ;;  %383 = vmatprep.subr.bf16.mxu1 %v430_v3  ;;  %vm433_vm2 = vmmov 1  }
   0x2   :  { %v377_v4 = vpack.c.bf16 %v29_v1, %v28_v0  ;;  %v31_v5 = vld [vmem:[%s552_s1 + $0x18] sm:$0x3]  ;;  %343 = vmatprep.mubr.msk.f32.mxu0 %vm431_vm1, %v432_v6  ;;  %v118_v7 = vld [vmem:[%s554_s3] sm:$0xff]  ;;  %v119_v8 = vld [vmem:[%s554_s3 + $0x8] sm:$0xff]  ;;  %362 = vmatprep.mubr.msk.f32.mxu1 %vm431_vm1, %v432_v6 }
   0x3   :  { %v120_v9 = vld [vmem:[%s554_s3 + $0x10] sm:$0xff]  ;;  %v380_v10 = vpack.c.bf16 %v31_v5, %v30_v2  ;;  %vm381_vm3 = vmpackc.low %vm43_vm0, %vm433_vm2  ;;  %v384_v11 = vpack.c.bf16 %v119_v8, %v118_v7  ;;  %v121_v12 = vld [vmem:[%s554_s3 + $0x18] sm:$0xff] }
   0x4   :  { %378 = vmatpush3.bf16.msra.mxu0 %v377_v4 }
   0x5   :  { %379 = vmatprep.subr.bf16.mxu0 %v430_v3 }
   0x6   :  { %12 = vsyncpa [#allocation3], 0  ;;  %385 = vmatpush3.bf16.msra.mxu1 %v384_v11  ;;  %v387_v13 = vpack.c.bf16 %v121_v12, %v120_v9  ;;  %v122_v14 = vld [vmem:[%s554_s3 + $0x20] sm:$0xff]  ;;  %v123_v15 = vld [vmem:[%s554_s3 + $0x28] sm:$0xff]  ;;  %vm39_vm4 = vcmask 211968   ;;  %vm133_vm5 = vcmask 523264  }
   0x7   :  { %386 = vmatprep.subr.bf16.mxu1 %v430_v3  ;;  %v27_v16 = vld [vmem:[%s551_s0] sm:$0xff]  ;;  %v390_v17 = vpack.c.bf16 %v123_v15, %v122_v14  ;;  %v124_v18 = vld [vmem:[%s554_s3 + $0x30] sm:$0xff]  ;;  %v125_v19 = vld [vmem:[%s554_s3 + $0x38] sm:$0xff]  ;;  %vm219_vm6 = vcmask 261120   ;;  %s434_s14 = smov [#allocation2]   ;;  %vm293_vm7 = vcmask 818176  }
   0x8   :  { %382 = vmatpush3.bf16.msk.msra.mxu0 %vm381_vm3, %v380_v10  ;;  %v393_v20 = vpack.c.bf16 %v125_v19, %v124_v18  ;;  %v208_v21 = vld [vmem:[%s556_s5] sm:$0xff]  ;;  %v209_v22 = vld [vmem:[%s556_s5 + $0x8] sm:$0xff]  ;;  %v210_v29 = vld [vmem:[%s556_s5 + $0x10] sm:$0xff]  ;;  %s301_s1 = sshll.u32 %s434_s14, 4  ;;  %s302_s1 = int_to_ptr.vmem [resolvable:$true] %s301_s1 }
   0x9   :  { %395 = vmatprep.subr.bf16.mxu0 %v430_v3  ;;  %v396_v23 = vpack.c.bf16 %v209_v22, %v208_v21  ;;  %v309_v24 = vld [vmem:[%s553_s2] ss:$0 sm:$0xff]  ;;  %v211_v30 = vld [vmem:[%s556_s5 + $0x18] sm:$0xff]  ;;  %s406_s5 = scalar_lea.vmem %s302_s1, 128  ;;  %p411_p1 = scmp.lt.s32.totalorder %s302_s1, %s302_s1 }
   0xa   :  { %388 = vmatpush3.bf16.msra.mxu1 %v387_v13  ;;  %v399_v31 = vpack.c.bf16 %v211_v30, %v210_v29  ;;  %v312_v32 = vld [vmem:[%s555_s4] ss:$0 sm:$0xff]  ;;  %p407_p0 = scmp.ne.s32.totalorder %s302_s1, %s406_s5  ;;  %p412_p2 = scmp.lt.s32.totalorder %s406_s5, %s406_s5 }
   0xb   :  { %344 = vmatmul.mubr.msk.f32.vlgmr.msra.gmra.mrb[0].mxu0 %vm39_vm4, %v27_v16  ;;  %389 = vmatprep.subr.bf16.mxu1 %v430_v3  ;;  %v314_v37 = vld [vmem:[%s557_s6] ss:$0 sm:$0xff] }
   0xc   :  { %373 = vmatprep.mubr.msk.f32.mxu0 %vm431_vm1, %v432_v6  ;;  %397 = vmatpush3.bf16.msra.mxu0 %v396_v23  ;;  %p413_p3 = por %p412_p2, %p411_p1 }
   0xd   :  { %398 = vmatprep.subr.bf16.mxu0 %v430_v3 }
   0xe   :  { %391 = vmatpush3.bf16.msra.mxu1 %v390_v17  ;;  %p414_p4 = pnand %p413_p3, %p407_p0 }
   0xf   :  { %392 = vmatprep.subr.bf16.mxu1 %v430_v3 }
  0x10   :  { %400 = vmatpush3.bf16.msra.mxu0 %v399_v31 }
  0x12   :  { %394 = vmatpush3.bf16.msra.mxu1 %v393_v20 }
  0xde   :  { %v113_v25 = vpop.f32.mrb[0].mxu0 }
  0xdf   :  { %v114_v26 = vadd.f32 %v309_v24, %v113_v25  ;;  %v345_v27 = vpop.f32.mrb[1].mxu0 }
  0xe1   :  { %v117_v28 = vmax.f32 %v114_v26, 0.0 }
  0xe3   :  { %363 = vmatmul.mubr.msk.f32.vlgmr.msra.gmra.mrb[0].mxu1 %vm133_vm5, %v117_v28 }
 0x1b6   :  { %v203_v33 = vpop.f32.mrb[0].mxu1 }
 0x1b7   :  { %v204_v34 = vadd.f32 %v312_v32, %v203_v33  ;;  %v364_v35 = vpop.f32.mrb[1].mxu1 }
 0x1b9   :  { %v207_v36 = vmax.f32 %v204_v34, 0.0 }
 0x1bb   :  { %374 = vmatmul.mubr.msk.f32.vlgmr.msra.gmra.mrb[2].mxu0 %vm219_vm6, %v207_v36 }
 0x28e   :  { %v289_v38 = vpop.f32.mrb[2].mxu0 }
 0x28f   :  { %v290_v39 = vadd.f32 %v314_v37, %v289_v38  ;;  %v375_v40 = vpop.f32.mrb[3].mxu0 }
 0x291   :  { %294 = vst.msk [vmem:[#allocation2] sm:$0xff] %vm293_vm7, %v290_v39 }
 0x292   :  { %417 = shalt.err (!%p414_p4)
}
 0x293   :  { %s418_s16 = scalar_lea.hbm %s558_s7, 128 }
 0x294   :  { %p419_p5 = scmp.ne.s32.totalorder %s558_s7, %s418_s16  ;;  %p422_p6 = scmp.lt.u32.totalorder %s418_s16, %s558_s7 }
 0x296   :  { %p424_p7 = pnand %p422_p6, %p419_p5 }
 0x298   :  { %427 = shalt.err (!%p424_p7)
}
 0x299   :  { %304 = dma.vmem_to_hbm [thread:$0]  %s302_s1, 128, %s558_s7, [#allocation3]  }
 0x29a   :  { %428 = dma.done.wait [#allocation3], 128  }
 0x29b   :  { %429 = vsyncadd [#allocation3], 4294967168 }
 0x29c   :  { %308 = vsyncpa [#allocation3], 1 }

</bundles_post_ra>
